<compile_context>
chip_gen: v7x
topology: tpu7x:2x2x1
jax: 0.10.0
libtpu: 0.0.40
codegen_flags: <defaults>
</compile_context>

<pallas_src>
import jax
import jax.numpy as jnp
from jax import lax
from jax.experimental import pallas as pl
from jax.experimental.pallas import tpu as pltpu


# ---------------------------------------------------------------------------
# small helpers
# ---------------------------------------------------------------------------
def _cdiv(a, b):
    return -(-a // b)


def _round_up(x, m):
    return ((x + m - 1) // m) * m


def _stable_bce(x, y):
    # numerically stable BCE-with-logits: max(x,0) - x*y + log(1 + exp(-|x|))
    return jnp.maximum(x, 0.0) - x * y + jnp.log1p(jnp.exp(-jnp.abs(x)))


def _tpu_vmem_capacity_bytes():
    try:
        return int(getattr(pltpu.get_tpu_info(), "vmem_capacity_bytes", 64 << 20))
    except Exception:
        return 64 << 20  # conservative (v7x-sized) fallback


def _vmem_config(block_budget_bytes):
    """Per-generation (block budget, scoped-VMEM limit)."""
    cap = _tpu_vmem_capacity_bytes()
    if cap >= (100 << 20):          # v5e / v6e class: 128 MiB physical VMEM
        budget, limit = 4 << 20, 64 << 20
    else:                            # v7x class: 64 MiB physical per TC
        budget, limit = 3 << 20, 32 << 20
    if block_budget_bytes is not None:
        budget = int(block_budget_bytes)
    return budget, limit


def _pick_row_tile(rows, cols, itemsize, budget_bytes):
    """Largest row tile (multiple of 8, or full extent) within the VMEM budget."""
    if rows <= 8:
        return rows
    t = budget_bytes // max(1, cols * itemsize)
    if t >= rows:
        return rows
    return max(8, (t // 8) * 8)


def _balanced_tile(rows, nt):
    """Row tile so this stream spreads over ~nt grid steps ((8,·) legal)."""
    t = _round_up(_cdiv(rows, nt), 8)
    return rows if t >= rows else t


# ---------------------------------------------------------------------------
# in-kernel reductions: per-tile loss tensor -> (8, 128) partial slab whose
# element-sum equals the tile's masked loss sum (VPU adds where possible).
# ---------------------------------------------------------------------------
def _col_to_slab(col):
    t = col.shape[0]
    lane = lax.broadcasted_iota(jnp.int32, (8, 128), 1)
    if t % 8 == 0:
        col8 = jnp.sum(col.reshape(t // 8, 8, 1), axis=0)        # (8, 1), VPU adds
        return jnp.where(lane == 0, col8, 0.0)                   # embed in lane 0
    sub = lax.broadcasted_iota(jnp.int32, (8, 128), 0)
    s = jnp.sum(col)                                             # tiny tile fallback
    return jnp.where((lane == 0) & (sub == 0), s, 0.0)


def _tile_to_slab(loss):
    t, c = loss.shape
    if c == 128 and t % 8 == 0:
        # lane-dense stream: pure sublane-group VPU accumulation
        return jnp.sum(loss.reshape(t // 8, 8, 128), axis=0)
    if c > 1:
        loss = jnp.sum(loss, axis=-1, keepdims=True)
    return _col_to_slab(loss)


# ---------------------------------------------------------------------------
# fused kernel factory (static config baked in at trace time)
# ---------------------------------------------------------------------------
def _make_fused_kernel(*, softmax_mode, ta, rows_a, tb, rows_b, inv_a, inv_b):
    def kernel(a_ref, aux_ref, x2_ref, y2_ref, out_ref):
        i = pl.program_id(0)

        # ---- stream A: image loss (softmax-CE or BCE, depending on labels) ----
        xa = a_ref[...].astype(jnp.float32)                       # (ta, Ca)
        row_a = lax.broadcasted_iota(jnp.int32, (ta, 1), 0) + i * ta
        valid_a = row_a < rows_a                                  # (ta, 1)
        if softmax_mode:
            lbl = aux_ref[...]                                    # (ta, 1) int32
            m = jnp.max(xa, axis=-1, keepdims=True)
            lse = jnp.log(jnp.sum(jnp.exp(xa - m), axis=-1, keepdims=True)) + m
            cls = lax.broadcasted_iota(jnp.int32, xa.shape, 1)
            sel = jnp.sum(jnp.where(cls == lbl, xa, 0.0), axis=-1, keepdims=True)
            loss_a = jnp.where(valid_a, lse - sel, 0.0)           # (ta, 1)
            slab_a = _col_to_slab(loss_a)
        else:
            ya = aux_ref[...].astype(jnp.float32)                 # (ta, Ca)
            loss_a = jnp.where(valid_a, _stable_bce(xa, ya), 0.0)
            slab_a = _tile_to_slab(loss_a)

        # ---- stream B: diagnosis BCE (lane-dense slab when possible) ----------
        xb = x2_ref[...].astype(jnp.float32)                      # (tb, L2)
        yb = y2_ref[...].astype(jnp.float32)
        row_b = lax.broadcasted_iota(jnp.int32, (tb, 1), 0) + i * tb
        valid_b = row_b < rows_b
        loss_b = jnp.where(valid_b, _stable_bce(xb, yb), 0.0)
        slab_b = _tile_to_slab(loss_b)

        # ---- per-tile weighted partial, lane-dense (1, 8, 128) output ---------
        out_ref[...] = (inv_a * slab_a + inv_b * slab_b)[None]

    return kernel


# ---------------------------------------------------------------------------
# CE module forward (weights are constructor scalars; no learned params)
# ---------------------------------------------------------------------------
def ce_forward(img_logits, labels, diag_logits, text, reports=None,
               img_weight=1.0, diag_weight=1.0, report_weight=1.0,
               block_budget_bytes=None, cast_to_bf16=False):
    img_logits = jnp.asarray(img_logits)
    labels = jnp.asarray(labels)
    diag_logits = jnp.asarray(diag_logits)
    text_t = jnp.asarray(text)

    if cast_to_bf16:
        # Optional HBM-bytes halving for this bandwidth-bound kernel; off by
        # default so the f32 semantics of the original module are preserved.
        img_logits = img_logits.astype(jnp.bfloat16)
        diag_logits = diag_logits.astype(jnp.bfloat16)
        text_t = text_t.astype(jnp.bfloat16)
        if labels.ndim != 1:
            labels = labels.astype(jnp.bfloat16)

    B, C = img_logits.shape
    softmax_mode = (labels.ndim == 1)

    # ---- stream A layout ---------------------------------------------------
    if softmax_mode:
        a_mat = img_logits
        aux = labels.reshape(B, 1).astype(jnp.int32)
        rows_a, cols_a, aux_cols = B, C, 1
        cnt_a = B
    else:
        # 2-D labels -> BCEWithLogitsLoss on img_logits (as in the module)
        if (B * C) % 128 == 0:
            a_mat = img_logits.reshape(-1, 128)          # lane-dense, free reshape
            aux = labels.reshape(-1, 128)
        else:
            a_mat = img_logits
            aux = labels
        rows_a, cols_a = a_mat.shape
        aux_cols = cols_a
        cnt_a = B * C

    # ---- stream B layout (diag BCE) -----------------------------------------
    n2 = int(diag_logits.size)
    if n2 % 128 == 0:
        x2 = diag_logits.reshape(-1, 128)                # lane-dense, free reshape
        y2 = text_t.reshape(-1, 128)
    else:
        x2 = diag_logits.reshape(diag_logits.shape[0], -1)
        y2 = text_t.reshape(text_t.shape[0], -1)
    rows_b, l2 = x2.shape
    cnt_b = n2

    # ---- per-generation tiling / VMEM budget --------------------------------
    budget, vmem_limit = _vmem_config(block_budget_bytes)
    ta0 = _pick_row_tile(rows_a, cols_a, a_mat.dtype.itemsize, budget)
    tb0 = _pick_row_tile(rows_b, l2, x2.dtype.itemsize, budget)
    nt = max(_cdiv(rows_a, ta0), _cdiv(rows_b, tb0))
    ta = _balanced_tile(rows_a, nt)
    tb = _balanced_tile(rows_b, nt)
    nt_a = _cdiv(rows_a, ta)
    nt_b = _cdiv(rows_b, tb)

    a_spec = pl.BlockSpec((ta, cols_a), lambda i: (jnp.minimum(i, nt_a - 1), 0))
    aux_spec = pl.BlockSpec((ta, aux_cols), lambda i: (jnp.minimum(i, nt_a - 1), 0))
    x2_spec = pl.BlockSpec((tb, l2), lambda i: (jnp.minimum(i, nt_b - 1), 0))
    y2_spec = pl.BlockSpec((tb, l2), lambda i: (jnp.minimum(i, nt_b - 1), 0))
    out_spec = pl.BlockSpec((1, 8, 128), lambda i: (i, 0, 0))

    kernel = _make_fused_kernel(
        softmax_mode=softmax_mode, ta=ta, rows_a=rows_a, tb=tb, rows_b=rows_b,
        inv_a=float(img_weight) / float(cnt_a),
        inv_b=float(diag_weight) / float(cnt_b))

    partials = pl.pallas_call(
        kernel,
        out_shape=jax.ShapeDtypeStruct((nt, 8, 128), jnp.float32),
        grid_spec=pltpu.PrefetchScalarGridSpec(
            num_scalar_prefetch=0,
            grid=(nt,),
            in_specs=[a_spec, aux_spec, x2_spec, y2_spec],
            out_specs=out_spec),
        compiler_params=pltpu.CompilerParams(
            dimension_semantics=("parallel",),
            vmem_limit_bytes=vmem_limit),
    )(a_mat, aux, x2, y2)

    total = jnp.sum(partials)                   # tiny (nt, 8, 128) reduce in XLA

    # TODO(synk): reports branch of the original module is ill-formed in PyTorch
    # (token IDs used as logits); only the reports=None path is reproduced.
    report_loss = jnp.float32(0.0)
    return (total + report_weight * report_loss).astype(jnp.float32)


# ---------------------------------------------------------------------------
# Pure-JAX reference for verification
# ---------------------------------------------------------------------------
def _ref_forward(img_logits, labels, diag_logits, text,
                 img_weight=1.0, diag_weight=1.0):
    xi = img_logits.astype(jnp.float32)
    if labels.ndim == 1:
        lse = jax.scipy.special.logsumexp(xi, axis=-1)
        picked = jnp.take_along_axis(xi, labels[:, None].astype(jnp.int32),
                                     axis=-1)[:, 0]
        img_loss = jnp.mean(lse - picked)
    else:
        img_loss = jnp.mean(_stable_bce(xi, labels.astype(jnp.float32)))
    diag_loss = jnp.mean(_stable_bce(diag_logits.astype(jnp.float32),
                                     text.astype(jnp.float32)))
    return img_weight * img_loss + diag_weight * diag_loss


if __name__ == "__main__":
    key = jax.random.PRNGKey(0)

    # --- test 1: module demo shapes (single tile, non-lane-dense diag) ------
    B, NUM_CLASSES, NUM_DISEASES = 2, 4, 8
    k1, k2, k3, k4 = jax.random.split(key, 4)
    img_logits = jax.random.normal(k1, (B, NUM_CLASSES), jnp.float32)
    labels = jax.random.randint(k2, (B,), 0, NUM_CLASSES).astype(jnp.int32)
    diag_logits = jax.random.normal(k3, (B, NUM_DISEASES), jnp.float32)
    text = (jax.random.uniform(k4, (B, NUM_DISEASES)) > 0.5).astype(jnp.float32)

    total = jax.block_until_ready(
        ce_forward(img_logits, labels, diag_logits, text, reports=None))
    ref = _ref_forward(img_logits, labels, diag_logits, text)
    assert jnp.allclose(total, ref, rtol=1e-4, atol=1e-5), (total, ref)

    # --- test 2: multi-tile grid, partial tile, lane-dense diag slab --------
    B2, C2, D2 = 600, 37, 64
    k1, k2, k3, k4 = jax.random.split(jax.random.PRNGKey(1), 4)
    il = jax.random.normal(k1, (B2, C2), jnp.float32)
    lb = jax.random.randint(k2, (B2,), 0, C2).astype(jnp.int32)
    dl = jax.random.normal(k3, (B2, D2), jnp.float32)
    tx = (jax.random.uniform(k4, (B2, D2)) > 0.5).astype(jnp.float32)
    total2 = jax.block_until_ready(
        ce_forward(il, lb, dl, tx, img_weight=0.7, diag_weight=1.3,
                   block_budget_bytes=32 << 10))
    ref2 = _ref_forward(il, lb, dl, tx, img_weight=0.7, diag_weight=1.3)
    assert jnp.allclose(total2, ref2, rtol=1e-4, atol=1e-5), (total2, ref2)

    # --- test 3: 2-D labels branch (img loss is BCE), lane-dense img slab ---
    B3, C3, D3 = 16, 32, 8
    k1, k2, k3, k4 = jax.random.split(jax.random.PRNGKey(2), 4)
    il3 = jax.random.normal(k1, (B3, C3), jnp.float32)
    lb3 = (jax.random.uniform(k2, (B3, C3)) > 0.5).astype(jnp.float32)
    dl3 = jax.random.normal(k3, (B3, D3), jnp.float32)
    tx3 = (jax.random.uniform(k4, (B3, D3)) > 0.5).astype(jnp.float32)
    total3 = jax.block_until_ready(ce_forward(il3, lb3, dl3, tx3))
    ref3 = _ref_forward(il3, lb3, dl3, tx3)
    assert jnp.allclose(total3, ref3, rtol=1e-4, atol=1e-5), (total3, ref3)

    # --- test 4: unbalanced streams (clamped, fully-masked img tail tiles) --
    B4, C4, D4 = 4, 16, 2048
    k1, k2, k3, k4 = jax.random.split(jax.random.PRNGKey(3), 4)
    il4 = jax.random.normal(k1, (B4, C4), jnp.float32)
    lb4 = jax.random.randint(k2, (B4,), 0, C4).astype(jnp.int32)
    dl4 = jax.random.normal(k3, (B4, D4), jnp.float32)
    tx4 = (jax.random.uniform(k4, (B4, D4)) > 0.5).astype(jnp.float32)
    total4 = jax.block_until_ready(
        ce_forward(il4, lb4, dl4, tx4, block_budget_bytes=4 << 10))
    ref4 = _ref_forward(il4, lb4, dl4, tx4)
    assert jnp.allclose(total4, ref4, rtol=1e-4, atol=1e-5), (total4, ref4)

    print("KERNEL_OK")
</pallas_src>

<mosaic_0001>
module attributes {stable_mosaic.version = 11 : i64} {
  func.func @kernel(%arg0: i32, %arg1: memref<2x4xf32, #tpu.memory_space<vmem>>, %arg2: memref<2x1xi32, #tpu.memory_space<vmem>>, %arg3: memref<2x8xf32, #tpu.memory_space<vmem>>, %arg4: memref<2x8xf32, #tpu.memory_space<vmem>>, %arg5: memref<1x8x128xf32, #tpu.memory_space<vmem>>) attributes {dimension_semantics = [#tpu.dimension_semantics<parallel>], iteration_bounds = array<i64: 1>, scalar_prefetch = 0 : i64, scratch_operands = 0 : i64, tpu.core_type = #tpu.core_type<tc>, window_params = [{transform_indices = @transform_0, window_bounds = array<i64: 2, 4>}, {transform_indices = @transform_1, window_bounds = array<i64: 2, 1>}, {transform_indices = @transform_2, window_bounds = array<i64: 2, 8>}, {transform_indices = @transform_3, window_bounds = array<i64: 2, 8>}, {transform_indices = @transform_4, window_bounds = array<i64: 1, 8, 128>}]} {
    %c0 = arith.constant 0 : index
    %c0_0 = arith.constant 0 : index
    %0 = vector.load %arg1[%c0, %c0_0] : memref<2x4xf32, #tpu.memory_space<vmem>>, vector<2x4xf32>
    %1 = tpu.iota {dimensions = array<i32: 0>} : vector<2x1xi32>
    %c2_i32 = arith.constant 2 : i32
    %2 = arith.muli %arg0, %c2_i32 : i32
    %3 = vector.broadcast %2 : i32 to vector<2x1xi32>
    %4 = arith.addi %1, %3 : vector<2x1xi32>
    %c2_i32_1 = arith.constant 2 : i32
    %5 = vector.broadcast %c2_i32_1 : i32 to vector<2x1xi32>
    %6 = arith.cmpi slt, %4, %5 : vector<2x1xi32>
    %c0_2 = arith.constant 0 : index
    %c0_3 = arith.constant 0 : index
    %7 = vector.load %arg2[%c0_2, %c0_3] : memref<2x1xi32, #tpu.memory_space<vmem>>, vector<2x1xi32>
    %cst = arith.constant dense<0xFF800000> : vector<2xf32>
    %8 = vector.multi_reduction <maximumf>, %0, %cst [1] : vector<2x4xf32> to vector<2xf32>
    %9 = vector.shape_cast %8 : vector<2xf32> to vector<2x1xf32>
    %10 = vector.broadcast %9 : vector<2x1xf32> to vector<2x4xf32>
    %11 = arith.subf %0, %10 : vector<2x4xf32>
    %12 = math.exp %11 : vector<2x4xf32>
    %cst_4 = arith.constant dense<0.000000e+00> : vector<2xf32>
    %13 = vector.multi_reduction <add>, %12, %cst_4 [1] : vector<2x4xf32> to vector<2xf32>
    %14 = vector.shape_cast %13 : vector<2xf32> to vector<2x1xf32>
    %15 = math.log %14 : vector<2x1xf32>
    %16 = arith.addf %15, %9 : vector<2x1xf32>
    %17 = tpu.iota {dimensions = array<i32: 1>} : vector<2x4xi32>
    %18 = vector.broadcast %7 : vector<2x1xi32> to vector<2x4xi32>
    %19 = arith.cmpi eq, %17, %18 : vector<2x4xi32>
    %cst_5 = arith.constant 0.000000e+00 : f32
    %20 = vector.broadcast %cst_5 : f32 to vector<2x4xf32>
    %21 = arith.select %19, %0, %20 : vector<2x4xi1>, vector<2x4xf32>
    %cst_6 = arith.constant dense<0.000000e+00> : vector<2xf32>
    %22 = vector.multi_reduction <add>, %21, %cst_6 [1] : vector<2x4xf32> to vector<2xf32>
    %23 = vector.shape_cast %22 : vector<2xf32> to vector<2x1xf32>
    %24 = arith.subf %16, %23 : vector<2x1xf32>
    %cst_7 = arith.constant 0.000000e+00 : f32
    %25 = vector.broadcast %cst_7 : f32 to vector<2x1xf32>
    %26 = arith.select %6, %24, %25 : vector<2x1xi1>, vector<2x1xf32>
    %27 = tpu.iota {dimensions = array<i32: 1>} : vector<8x128xi32>
    %28 = tpu.iota {dimensions = array<i32: 0>} : vector<8x128xi32>
    %29 = vector.shape_cast %26 : vector<2x1xf32> to vector<1x2x1xf32>
    %cst_8 = arith.constant dense<0.000000e+00> : vector<1xf32>
    %30 = vector.multi_reduction <add>, %29, %cst_8 [1, 2] : vector<1x2x1xf32> to vector<1xf32>
    %31 = vector.shape_cast %30 : vector<1xf32> to vector<1x1x1xf32>
    %32 = vector.extract %31[0, 0, 0] : f32 from vector<1x1x1xf32>
    %c0_i32 = arith.constant 0 : i32
    %33 = vector.broadcast %c0_i32 : i32 to vector<8x128xi32>
    %34 = arith.cmpi eq, %27, %33 : vector<8x128xi32>
    %c0_i32_9 = arith.constant 0 : i32
    %35 = vector.broadcast %c0_i32_9 : i32 to vector<8x128xi32>
    %36 = arith.cmpi eq, %28, %35 : vector<8x128xi32>
    %37 = arith.andi %34, %36 : vector<8x128xi1>
    %cst_10 = arith.constant 0.000000e+00 : f32
    %38 = vector.broadcast %32 : f32 to vector<8x128xf32>
    %39 = vector.broadcast %cst_10 : f32 to vector<8x128xf32>
    %40 = arith.select %37, %38, %39 : vector<8x128xi1>, vector<8x128xf32>
    %c0_11 = arith.constant 0 : index
    %c0_12 = arith.constant 0 : index
    %41 = vector.load %arg3[%c0_11, %c0_12] : memref<2x8xf32, #tpu.memory_space<vmem>>, vector<2x8xf32>
    %c0_13 = arith.constant 0 : index
    %c0_14 = arith.constant 0 : index
    %42 = vector.load %arg4[%c0_13, %c0_14] : memref<2x8xf32, #tpu.memory_space<vmem>>, vector<2x8xf32>
    %43 = tpu.iota {dimensions = array<i32: 0>} : vector<2x1xi32>
    %c2_i32_15 = arith.constant 2 : i32
    %44 = arith.muli %arg0, %c2_i32_15 : i32
    %45 = vector.broadcast %44 : i32 to vector<2x1xi32>
    %46 = arith.addi %43, %45 : vector<2x1xi32>
    %c2_i32_16 = arith.constant 2 : i32
    %47 = vector.broadcast %c2_i32_16 : i32 to vector<2x1xi32>
    %48 = arith.cmpi slt, %46, %47 : vector<2x1xi32>
    %cst_17 = arith.constant 0.000000e+00 : f32
    %49 = vector.broadcast %cst_17 : f32 to vector<2x8xf32>
    %50 = arith.maximumf %41, %49 : vector<2x8xf32>
    %51 = arith.mulf %41, %42 : vector<2x8xf32>
    %52 = arith.subf %50, %51 : vector<2x8xf32>
    %53 = math.absf %41 : vector<2x8xf32>
    %cst_18 = arith.constant 0.000000e+00 : f32
    %54 = vector.broadcast %cst_18 : f32 to vector<2x8xf32>
    %55 = arith.subf %54, %53 : vector<2x8xf32>
    %56 = math.exp %55 : vector<2x8xf32>
    %57 = math.log1p %56 : vector<2x8xf32>
    %58 = arith.addf %52, %57 : vector<2x8xf32>
    %cst_19 = arith.constant 0.000000e+00 : f32
    %59 = vector.shape_cast %48 : vector<2x1xi1> to vector<2x1xi1>
    %60 = vector.broadcast %59 : vector<2x1xi1> to vector<2x8xi1>
    %61 = vector.broadcast %cst_19 : f32 to vector<2x8xf32>
    %62 = arith.select %60, %58, %61 : vector<2x8xi1>, vector<2x8xf32>
    %cst_20 = arith.constant dense<0.000000e+00> : vector<2xf32>
    %63 = vector.multi_reduction <add>, %62, %cst_20 [1] : vector<2x8xf32> to vector<2xf32>
    %64 = vector.shape_cast %63 : vector<2xf32> to vector<2x1xf32>
    %65 = tpu.iota {dimensions = array<i32: 1>} : vector<8x128xi32>
    %66 = tpu.iota {dimensions = array<i32: 0>} : vector<8x128xi32>
    %67 = vector.shape_cast %64 : vector<2x1xf32> to vector<1x2x1xf32>
    %cst_21 = arith.constant dense<0.000000e+00> : vector<1xf32>
    %68 = vector.multi_reduction <add>, %67, %cst_21 [1, 2] : vector<1x2x1xf32> to vector<1xf32>
    %69 = vector.shape_cast %68 : vector<1xf32> to vector<1x1x1xf32>
    %70 = vector.extract %69[0, 0, 0] : f32 from vector<1x1x1xf32>
    %c0_i32_22 = arith.constant 0 : i32
    %71 = vector.broadcast %c0_i32_22 : i32 to vector<8x128xi32>
    %72 = arith.cmpi eq, %65, %71 : vector<8x128xi32>
    %c0_i32_23 = arith.constant 0 : i32
    %73 = vector.broadcast %c0_i32_23 : i32 to vector<8x128xi32>
    %74 = arith.cmpi eq, %66, %73 : vector<8x128xi32>
    %75 = arith.andi %72, %74 : vector<8x128xi1>
    %cst_24 = arith.constant 0.000000e+00 : f32
    %76 = vector.broadcast %70 : f32 to vector<8x128xf32>
    %77 = vector.broadcast %cst_24 : f32 to vector<8x128xf32>
    %78 = arith.select %75, %76, %77 : vector<8x128xi1>, vector<8x128xf32>
    %cst_25 = arith.constant 5.000000e-01 : f32
    %79 = vector.broadcast %cst_25 : f32 to vector<8x128xf32>
    %80 = arith.mulf %79, %40 : vector<8x128xf32>
    %cst_26 = arith.constant 6.250000e-02 : f32
    %81 = vector.broadcast %cst_26 : f32 to vector<8x128xf32>
    %82 = arith.mulf %81, %78 : vector<8x128xf32>
    %83 = arith.addf %80, %82 : vector<8x128xf32>
    %84 = vector.shape_cast %83 : vector<8x128xf32> to vector<1x8x128xf32>
    %c0_27 = arith.constant 0 : index
    %c0_28 = arith.constant 0 : index
    %c0_29 = arith.constant 0 : index
    %85 = vector.load %arg5[%c0_27, %c0_28, %c0_29] : memref<1x8x128xf32, #tpu.memory_space<vmem>>, vector<1x8x128xf32>
    tpu.vector_store %arg5[%c0_27, %c0_28, %c0_29], %84 {strides = array<i32>} : memref<1x8x128xf32, #tpu.memory_space<vmem>>, vector<1x8x128xf32>,
    return
  }
  func.func @transform_0(%arg0: i32) -> (i32, i32) {
    %c0_i32 = arith.constant 0 : i32
    %0 = arith.minsi %arg0, %c0_i32 : i32
    %c0_i32_0 = arith.constant 0 : i32
    %c0_i32_1 = arith.constant 0 : i32
    return %0, %c0_i32_0 : i32, i32
  }
  func.func @transform_1(%arg0: i32) -> (i32, i32) {
    %c0_i32 = arith.constant 0 : i32
    %0 = arith.minsi %arg0, %c0_i32 : i32
    %c0_i32_0 = arith.constant 0 : i32
    %c0_i32_1 = arith.constant 0 : i32
    return %0, %c0_i32_0 : i32, i32
  }
  func.func @transform_2(%arg0: i32) -> (i32, i32) {
    %c0_i32 = arith.constant 0 : i32
    %0 = arith.minsi %arg0, %c0_i32 : i32
    %c0_i32_0 = arith.constant 0 : i32
    %c0_i32_1 = arith.constant 0 : i32
    return %0, %c0_i32_0 : i32, i32
  }
  func.func @transform_3(%arg0: i32) -> (i32, i32) {
    %c0_i32 = arith.constant 0 : i32
    %0 = arith.minsi %arg0, %c0_i32 : i32
    %c0_i32_0 = arith.constant 0 : i32
    %c0_i32_1 = arith.constant 0 : i32
    return %0, %c0_i32_0 : i32, i32
  }
  func.func @transform_4(%arg0: i32) -> (i32, i32, i32) {
    %c0_i32 = arith.constant 0 : i32
    %c0_i32_0 = arith.constant 0 : i32
    %c0_i32_1 = arith.constant 0 : i32
    return %arg0, %c0_i32, %c0_i32_0 : i32, i32, i32
  }
}

</mosaic_0001>

<bundles_post_ra>
// kernel: tpu_custom_call.1
= control target key start
LH: loop header
LB: loop body
LE: loop exit
PB: predicated region body
PF: predicated region fallthrough
CT: control target
= control target key end

     0   :  { %vm26_vm0 = vcmask 25600   ;;  %v162_v2 = vmov 0   ;;  %s218_s0 = inlined_call_operand.vmem [shape: f32[2,4], index: 0, kind: input, shape index: {}]   ;;  %s219_s1 = inlined_call_operand.vmem [shape: s32[2,1], index: 1, kind: input, shape index: {}]   ;;  %s220_s2 = inlined_call_operand.vmem [shape: f32[2,8], index: 2, kind: input, shape index: {}]   ;;  %s221_s3 = inlined_call_operand.vmem [shape: f32[2,8], index: 3, kind: input, shape index: {}]   ;;  %s222_s4 = inlined_call_operand.hbm [shape: f32[1,8,128], index: 4, kind: output, shape index: {}]  }
   0x1   :  { %v18_v0 = vld [vmem:[%s218_s0] sm:$0x3]  ;;  %129 = vset.pattern.permute.xlu0 %v162_v2 }
   0x2   :  { %v27_v1 = vsel %vm26_vm0, %v18_v0, -inf }
   0x3   :  { %9 = vsyncpa [#allocation3], 0  ;;  %28 = vmax.xlane.f32.xlu0 %v27_v1  ;;  %v25_v3 = vld [vmem:[%s219_s1] sm:$0x3]  ;;  %v19_v14 = vlaneseq  ;;  %vm89_vm4 = vcmask 58368   ;;  %vm51_vm5 = vcmask 1024  }
   0x4   :  { %v67_v4 = vld [vmem:[%s220_s2] sm:$0x3] }
   0x5   :  { %v72_v5 = vand.u32 2147483647, %v67_v4  ;;  %v68_v15 = vld [vmem:[%s221_s3] sm:$0x3]  ;;  %v69_v19 = vmax.f32 %v67_v4, 0.0  ;;  %v40_v21 = vand.u32 127, %v19_v14 }
   0x6   :  { %v70_v20 = vmul.f32 %v68_v15, %v67_v4  ;;  %v20_v26 = vshrl.u32 %v19_v14, 7  ;;  %s163_s3 = smov [#allocation2]  }
   0x7   :  { %v73_v6 = vsub.f32 0.0, %v72_v5  ;;  %vm62_vm6 = vcmp.eq.s32.totalorder %v40_v21, 0  ;;  %s115_s22 = sshll.u32 %s163_s3, 4  ;;  %s116_s22 = int_to_ptr.vmem [resolvable:$true] %s115_s22 }
   0x8   :  { %v71_v25 = vsub.f32 %v69_v19, %v70_v20  ;;  %vm24_vm3 = vcmp.lt.s32.totalorder %v20_v26, 2  ;;  %vm63_vm7 = vcmp.eq.s32.totalorder %v20_v26, 0  ;;  %s138_s23 = scalar_lea.vmem %s116_s22, 128  ;;  %p143_p1 = scmp.lt.s32.totalorder %s116_s22, %s116_s22 }
   0x9   :  { %v74_v7 = vmul.f32 1.442695, %v73_v6  ;;  %vm64_vm8 = vmand %vm62_vm6, %vm63_vm7  ;;  %p139_p0 = scmp.ne.s32.totalorder %s116_s22, %s138_s23  ;;  %p144_p2 = scmp.lt.s32.totalorder %s138_s23, %s138_s23 }
   0xb   :  { %130 = vpow2.f32 %v74_v7  ;;  %p145_p3 = por %p144_p2, %p143_p1 }
   0xd   :  { %p146_p4 = pnand %p145_p3, %p139_p0 }
  0x15   :  { %v131_v8 = vpop.eup %130 }
  0x16   :  { %v76_v9 = vadd.f32 1.0, %v131_v8  ;;  %v79_v11 = vmul.f32 -0.5, %v131_v8  ;;  %v82_v18 = vand.u32 2147483647, %v131_v8 }
  0x18   :  { %132 = vlog2.f32 %v76_v9  ;;  %v80_v16 = vadd.f32 1.0, %v79_v11  ;;  %vm83_vm1 = vcmp.lt.f32.partialorder %v82_v18, 0.0004427343 }
  0x19   :  { %42 = vperm.xlu0 %129, %v25_v3  }
  0x1a   :  { %v81_v23 = vmul.f32 %v131_v8, %v80_v16 }
  0x22   :  { %v133_v17 = vpop.eup %132 }
  0x23   :  { %v78_v22 = vmul.f32 0.6931472, %v133_v17 }
  0x25   :  { %v84_v27 = vsel %vm83_vm1, %v81_v23, %v78_v22 }
  0x26   :  { %v85_v30 = vadd.f32 %v84_v27, %v71_v25 }
  0x28   :  { %v88_v33 = vsel %vm24_vm3, %v85_v30, 0.0 }
  0x29   :  { %v90_v34 = vsel %vm89_vm4, %v88_v33, 0.0 }
  0x90   :  { %v29_v10 = vpop.xlane.xlu0 %28 }
  0x91   :  { %v30_v12 = vsub.f32 %v18_v0, %v29_v10 }
  0x93   :  { %v31_v13 = vmul.f32 1.442695, %v30_v12 }
  0x95   :  { %134 = vpow2.f32 %v31_v13 }
  0x98   :  { %v43_v24 = vpop.permute.xlu0 %42 }
  0x99   :  { %vm44_vm2 = vcmp.eq.s32.totalorder %v40_v21, %v43_v24 }
  0x9a   :  { %v45_v29 = vsel %vm44_vm2, %v18_v0, 0.0 }
  0x9b   :  { %v46_v32 = vsel %vm26_vm0, %v45_v29, 0.0 }
  0x9f   :  { %v135_v28 = vpop.eup %134 }
  0xa0   :  { %v33_v31 = vsel %vm26_vm0, %v135_v28, 0.0 }
  0xa1   :  { %34 = vadd.xlane.f32.xlu1 %v33_v31 }
  0xa5   :  { %47 = vadd.xlane.f32.xlu1 %v46_v32 }
  0xa9   :  { %91 = vadd.xlane.f32.xlu1 %v90_v34 }
 0x12e   :  { %v35_v35 = vpop.xlane.xlu1 %34 }
 0x12f   :  { %136 = vlog2.f32 %v35_v35 }
 0x132   :  { %v48_v38 = vpop.xlane.xlu1 %47 }
 0x136   :  { %v92_v42 = vpop.xlane.xlu1 %91 }
 0x137   :  { %v93_v44 = vsel %vm51_vm5, %v92_v42, 0.0 }
 0x139   :  { %v137_v36 = vpop.eup %136 }
 0x13a   :  { %v37_v37 = vmul.f32 0.6931472, %v137_v36 }
 0x13c   :  { %v38_v39 = vadd.f32 %v37_v37, %v29_v10 }
 0x13e   :  { %v49_v40 = vsub.f32 %v38_v39, %v48_v38 }
 0x140   :  { %v50_v41 = vsel %vm24_vm3, %v49_v40, 0.0 }
 0x141   :  { %v52_v43 = vsel %vm51_vm5, %v50_v41, 0.0 }
 0x142   :  { %53 = vadd.xlane.f32.xlu1 %v52_v43 }
 0x146   :  { %94 = vadd.xlane.f32.xlu1 %v93_v44 }
 0x1cf   :  { %v54_v45 = vpop.xlane.xlu1 %53 }
 0x1d0   :  { %v55_v46 = vrot.slane %v54_v45, 4 }
 0x1d2   :  { %v56_v47 = vadd.f32 %v55_v46, %v54_v45 }
 0x1d3   :  { %v95_v48 = vpop.xlane.xlu1 %94 }
 0x1d4   :  { %v57_v49 = vrot.slane %v56_v47, 2  ;;  %v96_v50 = vrot.slane %v95_v48, 4 }
 0x1d6   :  { %v97_v51 = vadd.f32 %v96_v50, %v95_v48  ;;  %v58_v52 = vadd.f32 %v57_v49, %v56_v47 }
 0x1d8   :  { %v98_v53 = vrot.slane %v97_v51, 2  ;;  %v59_v54 = vrot.slane %v58_v52, 1 }
 0x1da   :  { %v99_v55 = vadd.f32 %v98_v53, %v97_v51  ;;  %v60_v56 = vadd.f32 %v59_v54, %v58_v52 }
 0x1dc   :  { %123 = vpush %v60_v56  ;;  %v100_v57 = vrot.slane %v99_v55, 1 }
 0x1de   :  { %v101_v58 = vadd.f32 %v100_v57, %v99_v55 }
 0x1e0   :  { %125 = vpush %v101_v58 }
 0x20d   :  { %s124_s1 = spop %123 }
 0x20e   :  { %v65_v59 = vstv %s124_s1 }
 0x20f   :  { %v66_v60 = vsel %vm64_vm8, %v65_v59, 0.0 }
 0x210   :  { %v105_v63 = vmul.f32 0.5, %v66_v60 }
 0x211   :  { %s126_s2 = spop %125 }
 0x212   :  { %v103_v61 = vstv %s126_s2 }
 0x213   :  { %v104_v62 = vsel %vm64_vm8, %v103_v61, 0.0 }
 0x214   :  { %v106_v0 = vmul.f32 0.0625, %v104_v62 }
 0x216   :  { %v107_v1 = vadd.f32 %v106_v0, %v105_v63 }
 0x218   :  { %108 = vst [vmem:[#allocation2] sm:$0xff] %v107_v1 }
 0x219   :  { %149 = shalt.err (!%p146_p4)
}
 0x21a   :  { %s150_s26 = scalar_lea.hbm %s222_s4, 128 }
 0x21b   :  { %p151_p5 = scmp.ne.s32.totalorder %s222_s4, %s150_s26  ;;  %p154_p6 = scmp.lt.u32.totalorder %s150_s26, %s222_s4 }
 0x21d   :  { %p156_p7 = pnand %p154_p6, %p151_p5 }
 0x21f   :  { %159 = shalt.err (!%p156_p7)
}
 0x220   :  { %118 = dma.vmem_to_hbm [thread:$0]  %s116_s22, 128, %s222_s4, [#allocation3]  }
 0x221   :  { %160 = dma.done.wait [#allocation3], 128  }
 0x222   :  { %161 = vsyncadd [#allocation3], 4294967168 }
 0x223   :  { %122 = vsyncpa [#allocation3], 1 }

</bundles_post_ra>
